<compile_context>
chip_gen: v6e
topology: v6e:2x2x1
jax: 0.10.0
libtpu: 0.0.40
codegen_flags: <defaults>
</compile_context>

<pallas_src>
import functools

import jax
import jax.numpy as jnp
from jax import lax
from jax.experimental import pallas as pl
from jax.experimental.pallas import tpu as pltpu


LANES = 128
SUBLANES = 8
TM_MAX = 1024  # rows per block: 1024 x 128 f32 = 512 KiB per input per buffer


def _cdiv(a, b):
    return (a + b - 1) // b


def _iou_sums_kernel(x_ref, y_ref, inter_ref, total_ref, *,
                     tm, rows_valid, steps_per_core, need_mask):
    """Accumulate (8,128) partials of sum(x*y) and sum(x+y) per core."""
    c = pl.program_id(0)   # parallel axis (TensorCore shard)
    s = pl.program_id(1)   # reduction axis

    @pl.when(s == 0)
    def _():
        inter_ref[...] = jnp.zeros_like(inter_ref)
        total_ref[...] = jnp.zeros_like(total_ref)

    x = x_ref[...].astype(jnp.float32)
    y = y_ref[...].astype(jnp.float32)

    if need_mask:
        # Mask rows past the end of the (row-padded) array: the last block of
        # the last core may extend beyond `rows_valid`.
        row0 = (c * steps_per_core + s) * tm
        row_ids = row0 + lax.broadcasted_iota(jnp.int32, (tm, LANES), 0)
        valid = row_ids < rows_valid
        x = jnp.where(valid, x, 0.0)
        y = jnp.where(valid, y, 0.0)

    prod = (x * y).reshape(tm // SUBLANES, SUBLANES, LANES)
    summ = (x + y).reshape(tm // SUBLANES, SUBLANES, LANES)
    inter_ref[...] += jnp.sum(prod, axis=0)
    total_ref[...] += jnp.sum(summ, axis=0)


@jax.jit
def _iou_loss_impl(inputs, targets, smooth):
    x = inputs.reshape(-1)
    y = targets.reshape(-1)
    n = x.shape[0]

    # Pad only up to the next multiple of one (8, 128) tile (usually a no-op).
    chunk = SUBLANES * LANES
    n_pad = _cdiv(n, chunk) * chunk
    pad = n_pad - n
    if pad:
        x = jnp.pad(x, (0, pad))
        y = jnp.pad(y, (0, pad))

    rows = n_pad // LANES
    x2 = x.reshape(rows, LANES)
    y2 = y.reshape(rows, LANES)

    tm = min(TM_MAX, rows)                   # rows is a multiple of 8, so tm is too
    total_steps = _cdiv(rows, tm)
    # Shard evenly across the 2 TensorCores on v7x; no-op on 1-TC chips.
    n_cores = 2 if (total_steps >= 2 and total_steps % 2 == 0) else 1
    steps_per_core = total_steps // n_cores
    need_mask = (rows % tm) != 0             # only the final block can be ragged

    kernel = functools.partial(
        _iou_sums_kernel,
        tm=tm, rows_valid=rows, steps_per_core=steps_per_core,
        need_mask=need_mask)

    in_map = lambda c, s: (c * steps_per_core + s, 0)
    out_map = lambda c, s: (c, 0)

    inter, total = pl.pallas_call(
        kernel,
        out_shape=(
            jax.ShapeDtypeStruct((n_cores * SUBLANES, LANES), jnp.float32),
            jax.ShapeDtypeStruct((n_cores * SUBLANES, LANES), jnp.float32),
        ),
        grid_spec=pltpu.PrefetchScalarGridSpec(
            num_scalar_prefetch=0,
            grid=(n_cores, steps_per_core),
            in_specs=[
                pl.BlockSpec((tm, LANES), in_map),
                pl.BlockSpec((tm, LANES), in_map),
            ],
            out_specs=[
                pl.BlockSpec((SUBLANES, LANES), out_map),
                pl.BlockSpec((SUBLANES, LANES), out_map),
            ],
        ),
        compiler_params=pltpu.CompilerParams(
            dimension_semantics=("parallel", "arbitrary")),
    )(x2, y2)

    intersection = jnp.sum(inter)
    tot = jnp.sum(total)
    union = tot - intersection
    iou = (intersection + smooth) / (union + smooth)
    return 1.0 - iou


def iou_loss(inputs, targets, smooth=1):
    """Pallas-backed IoU loss. Accepts any-shaped inputs/targets (same numel)."""
    return _iou_loss_impl(inputs, targets, jnp.float32(smooth))


def iou_loss_ref(inputs, targets, smooth=1):
    x = inputs.reshape(-1).astype(jnp.float32)
    y = targets.reshape(-1).astype(jnp.float32)
    intersection = jnp.sum(x * y)
    total = jnp.sum(x + y)
    union = total - intersection
    return 1.0 - (intersection + smooth) / (union + smooth)


if __name__ == "__main__":
    key = jax.random.PRNGKey(0)

    # Test 1: NCHW segmentation head, batch=2, channels=4, spatial=16x16.
    k1, k2, k3, k4 = jax.random.split(key, 4)
    shape = (2, 4, 16, 16)
    inputs = jax.nn.sigmoid(jax.random.normal(k1, shape, dtype=jnp.float32))
    targets = (jax.random.uniform(k2, shape) > 0.5).astype(jnp.float32)

    out = jax.block_until_ready(iou_loss(inputs, targets, smooth=1))
    ref = iou_loss_ref(inputs, targets, smooth=1)
    assert jnp.allclose(out, ref, rtol=1e-5, atol=1e-5), (out, ref)

    # Test 2: ragged size exercising the pad/mask and 2-core code paths.
    shape2 = (1, 3, 200, 224)
    inputs2 = jax.nn.sigmoid(jax.random.normal(k3, shape2, dtype=jnp.float32))
    targets2 = (jax.random.uniform(k4, shape2) > 0.5).astype(jnp.float32)

    out2 = jax.block_until_ready(iou_loss(inputs2, targets2, smooth=1))
    ref2 = iou_loss_ref(inputs2, targets2, smooth=1)
    assert jnp.allclose(out2, ref2, rtol=1e-5, atol=1e-5), (out2, ref2)

    print("KERNEL_OK")
</pallas_src>

<mosaic_0001>
module attributes {stable_mosaic.version = 11 : i64} {
  func.func @_iou_sums_kernel(%arg0: i32, %arg1: i32, %arg2: memref<16x128xf32, #tpu.memory_space<vmem>>, %arg3: memref<16x128xf32, #tpu.memory_space<vmem>>, %arg4: memref<8x128xf32, #tpu.memory_space<vmem>>, %arg5: memref<8x128xf32, #tpu.memory_space<vmem>>) attributes {dimension_semantics = [#tpu.dimension_semantics<parallel>, #tpu.dimension_semantics<arbitrary>], iteration_bounds = array<i64: 1, 1>, scalar_prefetch = 0 : i64, scratch_operands = 0 : i64, tpu.core_type = #tpu.core_type<tc>, window_params = [{transform_indices = @transform_0, window_bounds = array<i64: 16, 128>}, {transform_indices = @transform_1, window_bounds = array<i64: 16, 128>}, {transform_indices = @transform_2, window_bounds = array<i64: 8, 128>}, {transform_indices = @transform_3, window_bounds = array<i64: 8, 128>}]} {
    %c0_i32 = arith.constant 0 : i32
    %0 = arith.cmpi eq, %arg1, %c0_i32 : i32
    %1 = arith.extui %0 : i1 to i32
    %c0_i32_0 = arith.constant 0 : i32
    %2 = arith.cmpi ne, %1, %c0_i32_0 : i32
    scf.if %2 {
      %cst_13 = arith.constant 0.000000e+00 : f32
      %17 = vector.broadcast %cst_13 : f32 to vector<8x128xf32>
      %c0_14 = arith.constant 0 : index
      %c0_15 = arith.constant 0 : index
      %18 = vector.load %arg4[%c0_14, %c0_15] : memref<8x128xf32, #tpu.memory_space<vmem>>, vector<8x128xf32>
      tpu.vector_store %arg4[%c0_14, %c0_15], %17 {strides = array<i32>} : memref<8x128xf32, #tpu.memory_space<vmem>>, vector<8x128xf32>,
      %cst_16 = arith.constant 0.000000e+00 : f32
      %19 = vector.broadcast %cst_16 : f32 to vector<8x128xf32>
      %c0_17 = arith.constant 0 : index
      %c0_18 = arith.constant 0 : index
      %20 = vector.load %arg5[%c0_17, %c0_18] : memref<8x128xf32, #tpu.memory_space<vmem>>, vector<8x128xf32>
      tpu.vector_store %arg5[%c0_17, %c0_18], %19 {strides = array<i32>} : memref<8x128xf32, #tpu.memory_space<vmem>>, vector<8x128xf32>,
    } else {
    }
    %c0 = arith.constant 0 : index
    %c0_1 = arith.constant 0 : index
    %3 = vector.load %arg2[%c0, %c0_1] : memref<16x128xf32, #tpu.memory_space<vmem>>, vector<16x128xf32>
    %c0_2 = arith.constant 0 : index
    %c0_3 = arith.constant 0 : index
    %4 = vector.load %arg3[%c0_2, %c0_3] : memref<16x128xf32, #tpu.memory_space<vmem>>, vector<16x128xf32>
    %5 = arith.mulf %3, %4 : vector<16x128xf32>
    %6 = vector.shape_cast %5 : vector<16x128xf32> to vector<2x8x128xf32>
    %7 = arith.addf %3, %4 : vector<16x128xf32>
    %8 = vector.shape_cast %7 : vector<16x128xf32> to vector<2x8x128xf32>
    %c0_4 = arith.constant 0 : index
    %c0_5 = arith.constant 0 : index
    %9 = vector.load %arg4[%c0_4, %c0_5] : memref<8x128xf32, #tpu.memory_space<vmem>>, vector<8x128xf32>
    %cst = arith.constant dense<0.000000e+00> : vector<8x128xf32>
    %10 = vector.multi_reduction <add>, %6, %cst [0] : vector<2x8x128xf32> to vector<8x128xf32>
    %11 = arith.addf %9, %10 : vector<8x128xf32>
    %c0_6 = arith.constant 0 : index
    %c0_7 = arith.constant 0 : index
    %12 = vector.load %arg4[%c0_6, %c0_7] : memref<8x128xf32, #tpu.memory_space<vmem>>, vector<8x128xf32>
    tpu.vector_store %arg4[%c0_6, %c0_7], %11 {strides = array<i32>} : memref<8x128xf32, #tpu.memory_space<vmem>>, vector<8x128xf32>,
    %c0_8 = arith.constant 0 : index
    %c0_9 = arith.constant 0 : index
    %13 = vector.load %arg5[%c0_8, %c0_9] : memref<8x128xf32, #tpu.memory_space<vmem>>, vector<8x128xf32>
    %cst_10 = arith.constant dense<0.000000e+00> : vector<8x128xf32>
    %14 = vector.multi_reduction <add>, %8, %cst_10 [0] : vector<2x8x128xf32> to vector<8x128xf32>
    %15 = arith.addf %13, %14 : vector<8x128xf32>
    %c0_11 = arith.constant 0 : index
    %c0_12 = arith.constant 0 : index
    %16 = vector.load %arg5[%c0_11, %c0_12] : memref<8x128xf32, #tpu.memory_space<vmem>>, vector<8x128xf32>
    tpu.vector_store %arg5[%c0_11, %c0_12], %15 {strides = array<i32>} : memref<8x128xf32, #tpu.memory_space<vmem>>, vector<8x128xf32>,
    return
  }
  func.func @transform_0(%arg0: i32, %arg1: i32) -> (i32, i32) {
    %c1_i32 = arith.constant 1 : i32
    %0 = arith.muli %arg0, %c1_i32 : i32
    %1 = arith.addi %0, %arg1 : i32
    %c0_i32 = arith.constant 0 : i32
    %c0_i32_0 = arith.constant 0 : i32
    return %1, %c0_i32 : i32, i32
  }
  func.func @transform_1(%arg0: i32, %arg1: i32) -> (i32, i32) {
    %c1_i32 = arith.constant 1 : i32
    %0 = arith.muli %arg0, %c1_i32 : i32
    %1 = arith.addi %0, %arg1 : i32
    %c0_i32 = arith.constant 0 : i32
    %c0_i32_0 = arith.constant 0 : i32
    return %1, %c0_i32 : i32, i32
  }
  func.func @transform_2(%arg0: i32, %arg1: i32) -> (i32, i32) {
    %c0_i32 = arith.constant 0 : i32
    %c0_i32_0 = arith.constant 0 : i32
    return %arg0, %c0_i32 : i32, i32
  }
  func.func @transform_3(%arg0: i32, %arg1: i32) -> (i32, i32) {
    %c0_i32 = arith.constant 0 : i32
    %c0_i32_0 = arith.constant 0 : i32
    return %arg0, %c0_i32 : i32, i32
  }
}

</mosaic_0001>

<bundles_post_ra>
// kernel: _iou_loss_impl.1
= control target key start
LH: loop header
LB: loop body
LE: loop exit
PB: predicated region body
PF: predicated region fallthrough
CT: control target
= control target key end

     0   :  { %s138_s0 = inlined_call_operand.vmem [shape: f32[16,128], index: 0, kind: input, shape index: {}]   ;;  %s139_s1 = inlined_call_operand.vmem [shape: f32[16,128], index: 1, kind: input, shape index: {}]   ;;  %s140_s2 = inlined_call_operand.vmem [shape: f32[8,128], index: 2, kind: output, shape index: {0}]   ;;  %s141_s3 = inlined_call_operand.vmem [shape: f32[8,128], index: 3, kind: output, shape index: {1}]  }
   0x1   :  { %v63_v0 = vld [vmem:[%s138_s0] sm:$0xff]  ;;  %v64_v1 = vld [vmem:[%s138_s0 + $0x8] sm:$0xff] }
   0x2   :  { %v65_v2 = vld [vmem:[%s139_s1] sm:$0xff]  ;;  %v66_v3 = vld [vmem:[%s139_s1 + $0x8] sm:$0xff] }
   0x3   :  { %v67_v4 = vmul.f32 %v65_v2, %v63_v0  ;;  %v69_v5 = vadd.f32 %v65_v2, %v63_v0  ;;  %v68_v6 = vmul.f32 %v66_v3, %v64_v1  ;;  %v70_v7 = vadd.f32 %v66_v3, %v64_v1 }
   0x5   :  { %v72_v8 = vadd.f32 %v68_v6, %v67_v4  ;;  %v76_v9 = vadd.f32 %v70_v7, %v69_v5 }
   0x7   :  { %74 = vst [vmem:[%s140_s2] sm:$0xff] %v72_v8  ;;  %78 = vst [vmem:[%s141_s3] sm:$0xff] %v76_v9 }

</bundles_post_ra>
